<compile_context>
chip_gen: v7x
topology: tpu7x:2x2x1
jax: 0.10.0
libtpu: 0.0.40
codegen_flags: <defaults>
</compile_context>

<pallas_src>
import functools

import jax
import jax.numpy as jnp
from jax.experimental import pallas as pl
from jax.experimental.pallas import tpu as pltpu

# ---- model dims (small, synthetic) ------------------------------------------
B = 2          # batch
L = 8          # sequence length
D_MODEL = 32   # d_model = n_head * d_k
N_HEAD = 4
D_K = D_MODEL // N_HEAD   # = d_v
D_INNER = 64
LN_EPS = 1e-5


def _layer_norm(x, gamma, beta, eps):
    mu = jnp.mean(x, axis=-1, keepdims=True)
    xc = x - mu
    var = jnp.mean(xc * xc, axis=-1, keepdims=True)
    return xc * jax.lax.rsqrt(var + eps) * gamma + beta


def encoder_layer_kernel(x_ref, mask_ref, npm_ref,
                         wqkv_ref, bqkv_ref, wo_ref, bo_ref,
                         ln1g_ref, ln1b_ref,
                         w1_ref, b1_ref, w2_ref, b2_ref,
                         ln2g_ref, ln2b_ref,
                         out_ref, cat_ref,
                         *, batch, seq, d_model, n_head, d_k, mm_dtype):
    x = x_ref[...].astype(jnp.float32)        # (M, D), M = batch*seq
    npm = npm_ref[...].astype(jnp.float32)    # (M, 1)

    def mm(a, w):
        # MXU matmul with f32 accumulation; operands optionally bf16.
        return jnp.dot(a.astype(mm_dtype), w.astype(mm_dtype),
                       preferred_element_type=jnp.float32)

    # ---- fused QKV projection: one tall matmul over the whole batch ---------
    qkv = mm(x, wqkv_ref[...]) + bqkv_ref[...]            # (M, 3D)

    # heads -> leading batch axis (index n = h*batch + b).  Per-head lane
    # slices are stacked on a NEW leading axis (no lane concatenate of
    # outputs); the (H, M, dk) -> (H*B, L, dk) reshape is sublane-tile aligned.
    def split_heads(col0):
        parts = [qkv[:, col0 + h * d_k: col0 + (h + 1) * d_k]
                 for h in range(n_head)]
        return jnp.stack(parts, axis=0).reshape(n_head * batch, seq, d_k)

    qh = split_heads(0)             # (H*B, L, dk)
    kh = split_heads(d_model)
    vh = split_heads(2 * d_model)

    # ---- attention scores for all (head, batch) pairs: one batched einsum ---
    inv_temp = 1.0 / (float(d_k) ** 0.5)
    s = jnp.einsum('nqd,nkd->nqk', qh.astype(mm_dtype), kh.astype(mm_dtype),
                   preferred_element_type=jnp.float32) * inv_temp   # (H*B, L, L)

    # additive mask computed ONCE and replicated over heads (leading-axis copy)
    mask = mask_ref[...].astype(jnp.float32)                        # (B, L, L)
    mask_add = jnp.where(mask > 0.0, -1e9, 0.0)
    s = s + jnp.concatenate([mask_add] * n_head, axis=0)            # (H*B, L, L)

    # softmax (f32); reciprocal goes to the otherwise-idle EUP slot
    s = s - jnp.max(s, axis=-1, keepdims=True)
    p = jnp.exp(s)
    p = p * pl.reciprocal(jnp.sum(p, axis=-1, keepdims=True), approx=True)

    ctx = jnp.einsum('nqk,nkd->nqd', p.astype(mm_dtype), vh.astype(mm_dtype),
                     preferred_element_type=jnp.float32)            # (H*B, L, dk)

    # write head outputs into a (M, D) VMEM scratch instead of a lane concat
    for n in range(n_head * batch):
        h, b = n // batch, n % batch
        cat_ref[b * seq:(b + 1) * seq, h * d_k:(h + 1) * d_k] = ctx[n]
    cat = cat_ref[...]                                              # (M, D)

    # ---- output projection + residual + LayerNorm, gated by no_pad_mask -----
    attn = mm(cat, wo_ref[...]) + bo_ref[...]
    y = _layer_norm(attn + x, ln1g_ref[...], ln1b_ref[...], LN_EPS)
    y = y * npm                                  # attn *= no_pad_mask

    # ---- position-wise feed-forward (batch folded into rows) ----------------
    h1 = jnp.maximum(mm(y, w1_ref[...]) + b1_ref[...], 0.0)
    z = mm(h1, w2_ref[...]) + b2_ref[...] + y
    z = _layer_norm(z, ln2g_ref[...], ln2b_ref[...], LN_EPS)
    out_ref[...] = (z * npm).astype(out_ref.dtype)   # output *= no_pad_mask


def encoder_layer(x, pad_mask, no_pad_mask, params, *, matmul_dtype=jnp.float32):
    """x: (B,L,D) f32, pad_mask: (B,L,L) f32, no_pad_mask: (B,L,1) f32.

    Single Pallas invocation (no grid): the whole problem (<64 KiB live data)
    fits comfortably in VMEM on v5e/v6e/v7x.  Set matmul_dtype=jnp.bfloat16 on
    v6e/v7x for MXU-native operands (f32 accumulation is kept either way).
    """
    (wq, bq, wk, bk, wv, bv, wo, bo, ln1g, ln1b,
     w1, b1, w2, b2, ln2g, ln2b) = params
    Bb, Ll, Dd = x.shape
    d_k = Dd // N_HEAD
    M = Bb * Ll

    # wrapper-side weight packing: one fused QKV projection matrix
    w_qkv = jnp.concatenate([wq, wk, wv], axis=1)          # (D, 3D)
    b_qkv = jnp.concatenate([bq, bk, bv], axis=1)          # (1, 3D)

    # fold batch into rows (free layout plumbing in XLA)
    x2 = x.reshape(M, Dd)
    npm2 = no_pad_mask.reshape(M, 1)
    # NOTE: pad_mask is kept at its module-contract shape (B, L, L) for
    # semantic fidelity; at realistic L, pass a (B, L) key-pad vector instead.

    kernel = functools.partial(
        encoder_layer_kernel,
        batch=Bb, seq=Ll, d_model=Dd, n_head=N_HEAD, d_k=d_k,
        mm_dtype=matmul_dtype)

    out = pl.pallas_call(
        kernel,
        out_shape=jax.ShapeDtypeStruct((M, Dd), jnp.float32),
        scratch_shapes=[pltpu.VMEM((M, Dd), jnp.float32)],   # head-concat scratch
    )(x2, pad_mask, npm2, w_qkv, b_qkv, wo, bo, ln1g, ln1b,
      w1, b1, w2, b2, ln2g, ln2b)
    return out.reshape(Bb, Ll, Dd)


# ---- pure-JAX reference for validation ---------------------------------------
def encoder_layer_ref(x, pad_mask, no_pad_mask, params):
    (wq, bq, wk, bk, wv, bv, wo, bo, ln1g, ln1b, w1, b1, w2, b2, ln2g, ln2b) = params
    q = x @ wq + bq
    k = x @ wk + bk
    v = x @ wv + bv
    qh = q.reshape(B, L, N_HEAD, D_K).transpose(0, 2, 1, 3)
    kh = k.reshape(B, L, N_HEAD, D_K).transpose(0, 2, 1, 3)
    vh = v.reshape(B, L, N_HEAD, D_K).transpose(0, 2, 1, 3)
    s = jnp.einsum("bhqd,bhkd->bhqk", qh, kh) / (float(D_K) ** 0.5)
    s = jnp.where(pad_mask[:, None] > 0.0, -1e9, s)
    p = jax.nn.softmax(s, axis=-1)
    o = jnp.einsum("bhqk,bhkd->bhqd", p, vh).transpose(0, 2, 1, 3).reshape(B, L, D_MODEL)
    attn = o @ wo + bo
    y = attn + x
    mu = y.mean(-1, keepdims=True)
    var = ((y - mu) ** 2).mean(-1, keepdims=True)
    y = (y - mu) / jnp.sqrt(var + LN_EPS) * ln1g + ln1b
    y = y * no_pad_mask
    h1 = jnp.maximum(y @ w1 + b1, 0.0)
    z = h1 @ w2 + b2 + y
    mu2 = z.mean(-1, keepdims=True)
    var2 = ((z - mu2) ** 2).mean(-1, keepdims=True)
    z = (z - mu2) / jnp.sqrt(var2 + LN_EPS) * ln2g + ln2b
    return z * no_pad_mask


if __name__ == "__main__":
    key = jax.random.PRNGKey(0)
    ks = jax.random.split(key, 12)

    def glorot(k, shape):
        fan_in, fan_out = shape[-2], shape[-1]
        lim = (6.0 / (fan_in + fan_out)) ** 0.5
        return jax.random.uniform(k, shape, jnp.float32, -lim, lim)

    # parameters (deterministic init)
    wq = glorot(ks[0], (D_MODEL, D_MODEL)); bq = jnp.zeros((1, D_MODEL), jnp.float32)
    wk = glorot(ks[1], (D_MODEL, D_MODEL)); bk = jnp.zeros((1, D_MODEL), jnp.float32)
    wv = glorot(ks[2], (D_MODEL, D_MODEL)); bv = jnp.zeros((1, D_MODEL), jnp.float32)
    wo = glorot(ks[3], (D_MODEL, D_MODEL)); bo = jnp.zeros((1, D_MODEL), jnp.float32)
    ln1g = jnp.ones((1, D_MODEL), jnp.float32); ln1b = jnp.zeros((1, D_MODEL), jnp.float32)
    w1 = glorot(ks[4], (D_MODEL, D_INNER)); b1 = jnp.zeros((1, D_INNER), jnp.float32)
    w2 = glorot(ks[5], (D_INNER, D_MODEL)); b2 = jnp.zeros((1, D_MODEL), jnp.float32)
    ln2g = jnp.ones((1, D_MODEL), jnp.float32); ln2b = jnp.zeros((1, D_MODEL), jnp.float32)
    params = (wq, bq, wk, bk, wv, bv, wo, bo, ln1g, ln1b,
              w1, b1, w2, b2, ln2g, ln2b)

    # inputs
    x = jax.random.normal(ks[6], (B, L, D_MODEL), jnp.float32)
    lengths = jnp.array([L, L - 2], jnp.int32)              # second seq has 2 pad tokens
    key_pos = jnp.arange(L)[None, :]                        # (1, L)
    pad_1d = (key_pos >= lengths[:, None]).astype(jnp.float32)   # (B, L) 1.0 = pad
    pad_mask = jnp.broadcast_to(pad_1d[:, None, :], (B, L, L))   # (B, L, L)
    no_pad_mask = (1.0 - pad_1d)[:, :, None]                     # (B, L, 1)

    run = jax.jit(lambda xx, pm, npm: encoder_layer(xx, pm, npm, params))
    out = jax.block_until_ready(run(x, pad_mask, no_pad_mask))

    ref = encoder_layer_ref(x, pad_mask, no_pad_mask, params)
    assert out.shape == (B, L, D_MODEL)
    # tolerance accounts for the approximate (EUP) reciprocal in the softmax
    assert jnp.allclose(out, ref, atol=5e-3, rtol=5e-3), (
        f"max abs err {jnp.max(jnp.abs(out - ref))}")

    print("KERNEL_OK")
</pallas_src>

<mosaic_0001>
module attributes {stable_mosaic.version = 11 : i64} {
  func.func @encoder_layer_kernel(%arg0: memref<16x32xf32, #tpu.memory_space<vmem>>, %arg1: memref<2x8x8xf32, #tpu.memory_space<vmem>>, %arg2: memref<16x1xf32, #tpu.memory_space<vmem>>, %arg3: memref<32x96xf32, #tpu.memory_space<vmem>>, %arg4: memref<1x96xf32, #tpu.memory_space<vmem>>, %arg5: memref<32x32xf32, #tpu.memory_space<vmem>>, %arg6: memref<1x32xf32, #tpu.memory_space<vmem>>, %arg7: memref<1x32xf32, #tpu.memory_space<vmem>>, %arg8: memref<1x32xf32, #tpu.memory_space<vmem>>, %arg9: memref<32x64xf32, #tpu.memory_space<vmem>>, %arg10: memref<1x64xf32, #tpu.memory_space<vmem>>, %arg11: memref<64x32xf32, #tpu.memory_space<vmem>>, %arg12: memref<1x32xf32, #tpu.memory_space<vmem>>, %arg13: memref<1x32xf32, #tpu.memory_space<vmem>>, %arg14: memref<1x32xf32, #tpu.memory_space<vmem>>, %arg15: memref<16x32xf32, #tpu.memory_space<vmem>>, %arg16: memref<16x32xf32, #tpu.memory_space<vmem>>) attributes {dimension_semantics = [], scalar_prefetch = 0 : i64, scratch_operands = 1 : i64, tpu.core_type = #tpu.core_type<tc>} {
    %c0 = arith.constant 0 : index
    %c0_0 = arith.constant 0 : index
    %0 = vector.load %arg0[%c0, %c0_0] : memref<16x32xf32, #tpu.memory_space<vmem>>, vector<16x32xf32>
    %c0_1 = arith.constant 0 : index
    %c0_2 = arith.constant 0 : index
    %1 = vector.load %arg2[%c0_1, %c0_2] : memref<16x1xf32, #tpu.memory_space<vmem>>, vector<16x1xf32>
    %c0_3 = arith.constant 0 : index
    %c0_4 = arith.constant 0 : index
    %2 = vector.load %arg3[%c0_3, %c0_4] : memref<32x96xf32, #tpu.memory_space<vmem>>, vector<32x96xf32>
    %cst = arith.constant dense<0.000000e+00> : vector<16x96xf32>
    %3 = tpu.matmul %0, %2, %cst {dimension_numbers = #tpu.dot_dimension_numbers<[1], [0], [0], [1], [0, 0, 1, 1], [], []>} : vector<16x32xf32>, vector<32x96xf32>, vector<16x96xf32> -> vector<16x96xf32>
    %c0_5 = arith.constant 0 : index
    %c0_6 = arith.constant 0 : index
    %4 = vector.load %arg4[%c0_5, %c0_6] : memref<1x96xf32, #tpu.memory_space<vmem>>, vector<1x96xf32>
    %5 = vector.broadcast %4 : vector<1x96xf32> to vector<16x96xf32>
    %6 = arith.addf %3, %5 : vector<16x96xf32>
    %7 = vector.extract_strided_slice %6 {offsets = [0, 0], sizes = [16, 8], strides = [1, 1]} : vector<16x96xf32> to vector<16x8xf32>
    %8 = vector.extract_strided_slice %6 {offsets = [0, 8], sizes = [16, 8], strides = [1, 1]} : vector<16x96xf32> to vector<16x8xf32>
    %9 = vector.extract_strided_slice %6 {offsets = [0, 16], sizes = [16, 8], strides = [1, 1]} : vector<16x96xf32> to vector<16x8xf32>
    %10 = vector.extract_strided_slice %6 {offsets = [0, 24], sizes = [16, 8], strides = [1, 1]} : vector<16x96xf32> to vector<16x8xf32>
    %11 = vector.shape_cast %7 : vector<16x8xf32> to vector<1x16x8xf32>
    %12 = vector.shape_cast %8 : vector<16x8xf32> to vector<1x16x8xf32>
    %13 = vector.shape_cast %9 : vector<16x8xf32> to vector<1x16x8xf32>
    %14 = vector.shape_cast %10 : vector<16x8xf32> to vector<1x16x8xf32>
    %15 = tpu.concatenate %11, %12, %13, %14 in 0 : vector<1x16x8xf32>, vector<1x16x8xf32>, vector<1x16x8xf32>, vector<1x16x8xf32> -> vector<4x16x8xf32>
    %16 = vector.shape_cast %15 : vector<4x16x8xf32> to vector<8x8x8xf32>
    %17 = vector.extract_strided_slice %6 {offsets = [0, 32], sizes = [16, 8], strides = [1, 1]} : vector<16x96xf32> to vector<16x8xf32>
    %18 = vector.extract_strided_slice %6 {offsets = [0, 40], sizes = [16, 8], strides = [1, 1]} : vector<16x96xf32> to vector<16x8xf32>
    %19 = vector.extract_strided_slice %6 {offsets = [0, 48], sizes = [16, 8], strides = [1, 1]} : vector<16x96xf32> to vector<16x8xf32>
    %20 = vector.extract_strided_slice %6 {offsets = [0, 56], sizes = [16, 8], strides = [1, 1]} : vector<16x96xf32> to vector<16x8xf32>
    %21 = vector.shape_cast %17 : vector<16x8xf32> to vector<1x16x8xf32>
    %22 = vector.shape_cast %18 : vector<16x8xf32> to vector<1x16x8xf32>
    %23 = vector.shape_cast %19 : vector<16x8xf32> to vector<1x16x8xf32>
    %24 = vector.shape_cast %20 : vector<16x8xf32> to vector<1x16x8xf32>
    %25 = tpu.concatenate %21, %22, %23, %24 in 0 : vector<1x16x8xf32>, vector<1x16x8xf32>, vector<1x16x8xf32>, vector<1x16x8xf32> -> vector<4x16x8xf32>
    %26 = vector.shape_cast %25 : vector<4x16x8xf32> to vector<8x8x8xf32>
    %27 = vector.extract_strided_slice %6 {offsets = [0, 64], sizes = [16, 8], strides = [1, 1]} : vector<16x96xf32> to vector<16x8xf32>
    %28 = vector.extract_strided_slice %6 {offsets = [0, 72], sizes = [16, 8], strides = [1, 1]} : vector<16x96xf32> to vector<16x8xf32>
    %29 = vector.extract_strided_slice %6 {offsets = [0, 80], sizes = [16, 8], strides = [1, 1]} : vector<16x96xf32> to vector<16x8xf32>
    %30 = vector.extract_strided_slice %6 {offsets = [0, 88], sizes = [16, 8], strides = [1, 1]} : vector<16x96xf32> to vector<16x8xf32>
    %31 = vector.shape_cast %27 : vector<16x8xf32> to vector<1x16x8xf32>
    %32 = vector.shape_cast %28 : vector<16x8xf32> to vector<1x16x8xf32>
    %33 = vector.shape_cast %29 : vector<16x8xf32> to vector<1x16x8xf32>
    %34 = vector.shape_cast %30 : vector<16x8xf32> to vector<1x16x8xf32>
    %35 = tpu.concatenate %31, %32, %33, %34 in 0 : vector<1x16x8xf32>, vector<1x16x8xf32>, vector<1x16x8xf32>, vector<1x16x8xf32> -> vector<4x16x8xf32>
    %36 = vector.shape_cast %35 : vector<4x16x8xf32> to vector<8x8x8xf32>
    "tpu.trace_start"() <{level = 10 : i32, message = "nqd,nkd->nqk"}> : () -> ()
    %cst_7 = arith.constant dense<0.000000e+00> : vector<8x8x8xf32>
    %37 = tpu.matmul %16, %26, %cst_7 {dimension_numbers = #tpu.dot_dimension_numbers<[2], [2], [1], [1], [0, 0, 0, 1, 1, 1], [0], [0]>} : vector<8x8x8xf32>, vector<8x8x8xf32>, vector<8x8x8xf32> -> vector<8x8x8xf32>
    "tpu.trace_stop"() : () -> ()
    %cst_8 = arith.constant 0.353553385 : f32
    %38 = vector.broadcast %cst_8 : f32 to vector<8x8x8xf32>
    %39 = arith.mulf %37, %38 : vector<8x8x8xf32>
    %c0_9 = arith.constant 0 : index
    %c0_10 = arith.constant 0 : index
    %c0_11 = arith.constant 0 : index
    %40 = vector.load %arg1[%c0_9, %c0_10, %c0_11] : memref<2x8x8xf32, #tpu.memory_space<vmem>>, vector<2x8x8xf32>
    %cst_12 = arith.constant 0.000000e+00 : f32
    %41 = vector.broadcast %cst_12 : f32 to vector<2x8x8xf32>
    %42 = arith.cmpf ogt, %40, %41 : vector<2x8x8xf32>
    %cst_13 = arith.constant -1.000000e+09 : f32
    %cst_14 = arith.constant 0.000000e+00 : f32
    %43 = vector.broadcast %cst_13 : f32 to vector<2x8x8xf32>
    %44 = vector.broadcast %cst_14 : f32 to vector<2x8x8xf32>
    %45 = arith.select %42, %43, %44 : vector<2x8x8xi1>, vector<2x8x8xf32>
    %46 = tpu.concatenate %45, %45, %45, %45 in 0 : vector<2x8x8xf32>, vector<2x8x8xf32>, vector<2x8x8xf32>, vector<2x8x8xf32> -> vector<8x8x8xf32>
    %47 = arith.addf %39, %46 : vector<8x8x8xf32>
    %cst_15 = arith.constant dense<0xFF800000> : vector<8x8xf32>
    %48 = vector.multi_reduction <maximumf>, %47, %cst_15 [2] : vector<8x8x8xf32> to vector<8x8xf32>
    %49 = vector.shape_cast %48 : vector<8x8xf32> to vector<8x8x1xf32>
    %50 = vector.broadcast %49 : vector<8x8x1xf32> to vector<8x8x8xf32>
    %51 = arith.subf %47, %50 : vector<8x8x8xf32>
    %52 = math.exp %51 : vector<8x8x8xf32>
    %cst_16 = arith.constant dense<0.000000e+00> : vector<8x8xf32>
    %53 = vector.multi_reduction <add>, %52, %cst_16 [2] : vector<8x8x8xf32> to vector<8x8xf32>
    %54 = vector.shape_cast %53 : vector<8x8xf32> to vector<8x8x1xf32>
    %55 = tpu.reciprocal %54 {approx = true} : vector<8x8x1xf32> -> vector<8x8x1xf32>
    %56 = vector.broadcast %55 : vector<8x8x1xf32> to vector<8x8x8xf32>
    %57 = arith.mulf %52, %56 : vector<8x8x8xf32>
    "tpu.trace_start"() <{level = 10 : i32, message = "nqk,nkd->nqd"}> : () -> ()
    %cst_17 = arith.constant dense<0.000000e+00> : vector<8x8x8xf32>
    %58 = tpu.matmul %57, %36, %cst_17 {dimension_numbers = #tpu.dot_dimension_numbers<[2], [1], [1], [2], [0, 0, 0, 1, 1, 2], [0], [0]>} : vector<8x8x8xf32>, vector<8x8x8xf32>, vector<8x8x8xf32> -> vector<8x8x8xf32>
    "tpu.trace_stop"() : () -> ()
    %59 = vector.extract_strided_slice %58 {offsets = [0, 0, 0], sizes = [1, 8, 8], strides = [1, 1, 1]} : vector<8x8x8xf32> to vector<1x8x8xf32>
    %60 = vector.shape_cast %59 : vector<1x8x8xf32> to vector<8x8xf32>
    %c0_18 = arith.constant 0 : index
    %c0_19 = arith.constant 0 : index
    %61 = vector.load %arg16[%c0_18, %c0_19] : memref<16x32xf32, #tpu.memory_space<vmem>>, vector<8x8xf32>
    tpu.vector_store %arg16[%c0_18, %c0_19], %60 {strides = array<i32>} : memref<16x32xf32, #tpu.memory_space<vmem>>, vector<8x8xf32>,
    %62 = vector.extract_strided_slice %58 {offsets = [1, 0, 0], sizes = [1, 8, 8], strides = [1, 1, 1]} : vector<8x8x8xf32> to vector<1x8x8xf32>
    %63 = vector.shape_cast %62 : vector<1x8x8xf32> to vector<8x8xf32>
    %c8 = arith.constant 8 : index
    %c0_20 = arith.constant 0 : index
    %64 = vector.load %arg16[%c8, %c0_20] : memref<16x32xf32, #tpu.memory_space<vmem>>, vector<8x8xf32>
    tpu.vector_store %arg16[%c8, %c0_20], %63 {strides = array<i32>} : memref<16x32xf32, #tpu.memory_space<vmem>>, vector<8x8xf32>,
    %65 = vector.extract_strided_slice %58 {offsets = [2, 0, 0], sizes = [1, 8, 8], strides = [1, 1, 1]} : vector<8x8x8xf32> to vector<1x8x8xf32>
    %66 = vector.shape_cast %65 : vector<1x8x8xf32> to vector<8x8xf32>
    %c0_21 = arith.constant 0 : index
    %c8_22 = arith.constant 8 : index
    %67 = vector.load %arg16[%c0_21, %c8_22] : memref<16x32xf32, #tpu.memory_space<vmem>>, vector<8x8xf32>
    tpu.vector_store %arg16[%c0_21, %c8_22], %66 {strides = array<i32>} : memref<16x32xf32, #tpu.memory_space<vmem>>, vector<8x8xf32>,
    %68 = vector.extract_strided_slice %58 {offsets = [3, 0, 0], sizes = [1, 8, 8], strides = [1, 1, 1]} : vector<8x8x8xf32> to vector<1x8x8xf32>
    %69 = vector.shape_cast %68 : vector<1x8x8xf32> to vector<8x8xf32>
    %c8_23 = arith.constant 8 : index
    %c8_24 = arith.constant 8 : index
    %70 = vector.load %arg16[%c8_23, %c8_24] : memref<16x32xf32, #tpu.memory_space<vmem>>, vector<8x8xf32>
    tpu.vector_store %arg16[%c8_23, %c8_24], %69 {strides = array<i32>} : memref<16x32xf32, #tpu.memory_space<vmem>>, vector<8x8xf32>,
    %71 = vector.extract_strided_slice %58 {offsets = [4, 0, 0], sizes = [1, 8, 8], strides = [1, 1, 1]} : vector<8x8x8xf32> to vector<1x8x8xf32>
    %72 = vector.shape_cast %71 : vector<1x8x8xf32> to vector<8x8xf32>
    %c0_25 = arith.constant 0 : index
    %c16 = arith.constant 16 : index
    %73 = vector.load %arg16[%c0_25, %c16] : memref<16x32xf32, #tpu.memory_space<vmem>>, vector<8x8xf32>
    tpu.vector_store %arg16[%c0_25, %c16], %72 {strides = array<i32>} : memref<16x32xf32, #tpu.memory_space<vmem>>, vector<8x8xf32>,
    %74 = vector.extract_strided_slice %58 {offsets = [5, 0, 0], sizes = [1, 8, 8], strides = [1, 1, 1]} : vector<8x8x8xf32> to vector<1x8x8xf32>
    %75 = vector.shape_cast %74 : vector<1x8x8xf32> to vector<8x8xf32>
    %c8_26 = arith.constant 8 : index
    %c16_27 = arith.constant 16 : index
    %76 = vector.load %arg16[%c8_26, %c16_27] : memref<16x32xf32, #tpu.memory_space<vmem>>, vector<8x8xf32>
    tpu.vector_store %arg16[%c8_26, %c16_27], %75 {strides = array<i32>} : memref<16x32xf32, #tpu.memory_space<vmem>>, vector<8x8xf32>,
    %77 = vector.extract_strided_slice %58 {offsets = [6, 0, 0], sizes = [1, 8, 8], strides = [1, 1, 1]} : vector<8x8x8xf32> to vector<1x8x8xf32>
    %78 = vector.shape_cast %77 : vector<1x8x8xf32> to vector<8x8xf32>
    %c0_28 = arith.constant 0 : index
    %c24 = arith.constant 24 : index
    %79 = vector.load %arg16[%c0_28, %c24] : memref<16x32xf32, #tpu.memory_space<vmem>>, vector<8x8xf32>
    tpu.vector_store %arg16[%c0_28, %c24], %78 {strides = array<i32>} : memref<16x32xf32, #tpu.memory_space<vmem>>, vector<8x8xf32>,
    %80 = vector.extract_strided_slice %58 {offsets = [7, 0, 0], sizes = [1, 8, 8], strides = [1, 1, 1]} : vector<8x8x8xf32> to vector<1x8x8xf32>
    %81 = vector.shape_cast %80 : vector<1x8x8xf32> to vector<8x8xf32>
    %c8_29 = arith.constant 8 : index
    %c24_30 = arith.constant 24 : index
    %82 = vector.load %arg16[%c8_29, %c24_30] : memref<16x32xf32, #tpu.memory_space<vmem>>, vector<8x8xf32>
    tpu.vector_store %arg16[%c8_29, %c24_30], %81 {strides = array<i32>} : memref<16x32xf32, #tpu.memory_space<vmem>>, vector<8x8xf32>,
    %c0_31 = arith.constant 0 : index
    %c0_32 = arith.constant 0 : index
    %83 = vector.load %arg16[%c0_31, %c0_32] : memref<16x32xf32, #tpu.memory_space<vmem>>, vector<16x32xf32>
    %c0_33 = arith.constant 0 : index
    %c0_34 = arith.constant 0 : index
    %84 = vector.load %arg5[%c0_33, %c0_34] : memref<32x32xf32, #tpu.memory_space<vmem>>, vector<32x32xf32>
    %cst_35 = arith.constant dense<0.000000e+00> : vector<16x32xf32>
    %85 = tpu.matmul %83, %84, %cst_35 {dimension_numbers = #tpu.dot_dimension_numbers<[1], [0], [0], [1], [0, 0, 1, 1], [], []>} : vector<16x32xf32>, vector<32x32xf32>, vector<16x32xf32> -> vector<16x32xf32>
    %c0_36 = arith.constant 0 : index
    %c0_37 = arith.constant 0 : index
    %86 = vector.load %arg6[%c0_36, %c0_37] : memref<1x32xf32, #tpu.memory_space<vmem>>, vector<1x32xf32>
    %87 = vector.broadcast %86 : vector<1x32xf32> to vector<16x32xf32>
    %88 = arith.addf %85, %87 : vector<16x32xf32>
    %89 = arith.addf %88, %0 : vector<16x32xf32>
    %c0_38 = arith.constant 0 : index
    %c0_39 = arith.constant 0 : index
    %90 = vector.load %arg7[%c0_38, %c0_39] : memref<1x32xf32, #tpu.memory_space<vmem>>, vector<1x32xf32>
    %c0_40 = arith.constant 0 : index
    %c0_41 = arith.constant 0 : index
    %91 = vector.load %arg8[%c0_40, %c0_41] : memref<1x32xf32, #tpu.memory_space<vmem>>, vector<1x32xf32>
    %cst_42 = arith.constant dense<0.000000e+00> : vector<16xf32>
    %92 = vector.multi_reduction <add>, %89, %cst_42 [1] : vector<16x32xf32> to vector<16xf32>
    %93 = vector.shape_cast %92 : vector<16xf32> to vector<16x1xf32>
    %cst_43 = arith.constant 3.200000e+01 : f32
    %94 = vector.broadcast %cst_43 : f32 to vector<16x1xf32>
    %95 = arith.divf %93, %94 : vector<16x1xf32>
    %96 = vector.broadcast %95 : vector<16x1xf32> to vector<16x32xf32>
    %97 = arith.subf %89, %96 : vector<16x32xf32>
    %98 = arith.mulf %97, %97 : vector<16x32xf32>
    %cst_44 = arith.constant dense<0.000000e+00> : vector<16xf32>
    %99 = vector.multi_reduction <add>, %98, %cst_44 [1] : vector<16x32xf32> to vector<16xf32>
    %100 = vector.shape_cast %99 : vector<16xf32> to vector<16x1xf32>
    %cst_45 = arith.constant 3.200000e+01 : f32
    %101 = vector.broadcast %cst_45 : f32 to vector<16x1xf32>
    %102 = arith.divf %100, %101 : vector<16x1xf32>
    %cst_46 = arith.constant 9.99999974E-6 : f32
    %103 = vector.broadcast %cst_46 : f32 to vector<16x1xf32>
    %104 = arith.addf %102, %103 : vector<16x1xf32>
    %105 = math.rsqrt %104 : vector<16x1xf32>
    %106 = vector.broadcast %105 : vector<16x1xf32> to vector<16x32xf32>
    %107 = arith.mulf %97, %106 : vector<16x32xf32>
    %108 = vector.broadcast %90 : vector<1x32xf32> to vector<16x32xf32>
    %109 = arith.mulf %107, %108 : vector<16x32xf32>
    %110 = vector.broadcast %91 : vector<1x32xf32> to vector<16x32xf32>
    %111 = arith.addf %109, %110 : vector<16x32xf32>
    %112 = vector.broadcast %1 : vector<16x1xf32> to vector<16x32xf32>
    %113 = arith.mulf %111, %112 : vector<16x32xf32>
    %c0_47 = arith.constant 0 : index
    %c0_48 = arith.constant 0 : index
    %114 = vector.load %arg9[%c0_47, %c0_48] : memref<32x64xf32, #tpu.memory_space<vmem>>, vector<32x64xf32>
    %cst_49 = arith.constant dense<0.000000e+00> : vector<16x64xf32>
    %115 = tpu.matmul %113, %114, %cst_49 {dimension_numbers = #tpu.dot_dimension_numbers<[1], [0], [0], [1], [0, 0, 1, 1], [], []>} : vector<16x32xf32>, vector<32x64xf32>, vector<16x64xf32> -> vector<16x64xf32>
    %c0_50 = arith.constant 0 : index
    %c0_51 = arith.constant 0 : index
    %116 = vector.load %arg10[%c0_50, %c0_51] : memref<1x64xf32, #tpu.memory_space<vmem>>, vector<1x64xf32>
    %117 = vector.broadcast %116 : vector<1x64xf32> to vector<16x64xf32>
    %118 = arith.addf %115, %117 : vector<16x64xf32>
    %cst_52 = arith.constant 0.000000e+00 : f32
    %119 = vector.broadcast %cst_52 : f32 to vector<16x64xf32>
    %120 = arith.maximumf %118, %119 : vector<16x64xf32>
    %c0_53 = arith.constant 0 : index
    %c0_54 = arith.constant 0 : index
    %121 = vector.load %arg11[%c0_53, %c0_54] : memref<64x32xf32, #tpu.memory_space<vmem>>, vector<64x32xf32>
    %cst_55 = arith.constant dense<0.000000e+00> : vector<16x32xf32>
    %122 = tpu.matmul %120, %121, %cst_55 {dimension_numbers = #tpu.dot_dimension_numbers<[1], [0], [0], [1], [0, 0, 1, 1], [], []>} : vector<16x64xf32>, vector<64x32xf32>, vector<16x32xf32> -> vector<16x32xf32>
    %c0_56 = arith.constant 0 : index
    %c0_57 = arith.constant 0 : index
    %123 = vector.load %arg12[%c0_56, %c0_57] : memref<1x32xf32, #tpu.memory_space<vmem>>, vector<1x32xf32>
    %124 = vector.broadcast %123 : vector<1x32xf32> to vector<16x32xf32>
    %125 = arith.addf %122, %124 : vector<16x32xf32>
    %126 = arith.addf %125, %113 : vector<16x32xf32>
    %c0_58 = arith.constant 0 : index
    %c0_59 = arith.constant 0 : index
    %127 = vector.load %arg13[%c0_58, %c0_59] : memref<1x32xf32, #tpu.memory_space<vmem>>, vector<1x32xf32>
    %c0_60 = arith.constant 0 : index
    %c0_61 = arith.constant 0 : index
    %128 = vector.load %arg14[%c0_60, %c0_61] : memref<1x32xf32, #tpu.memory_space<vmem>>, vector<1x32xf32>
    %cst_62 = arith.constant dense<0.000000e+00> : vector<16xf32>
    %129 = vector.multi_reduction <add>, %126, %cst_62 [1] : vector<16x32xf32> to vector<16xf32>
    %130 = vector.shape_cast %129 : vector<16xf32> to vector<16x1xf32>
    %cst_63 = arith.constant 3.200000e+01 : f32
    %131 = vector.broadcast %cst_63 : f32 to vector<16x1xf32>
    %132 = arith.divf %130, %131 : vector<16x1xf32>
    %133 = vector.broadcast %132 : vector<16x1xf32> to vector<16x32xf32>
    %134 = arith.subf %126, %133 : vector<16x32xf32>
    %135 = arith.mulf %134, %134 : vector<16x32xf32>
    %cst_64 = arith.constant dense<0.000000e+00> : vector<16xf32>
    %136 = vector.multi_reduction <add>, %135, %cst_64 [1] : vector<16x32xf32> to vector<16xf32>
    %137 = vector.shape_cast %136 : vector<16xf32> to vector<16x1xf32>
    %cst_65 = arith.constant 3.200000e+01 : f32
    %138 = vector.broadcast %cst_65 : f32 to vector<16x1xf32>
    %139 = arith.divf %137, %138 : vector<16x1xf32>
    %cst_66 = arith.constant 9.99999974E-6 : f32
    %140 = vector.broadcast %cst_66 : f32 to vector<16x1xf32>
    %141 = arith.addf %139, %140 : vector<16x1xf32>
    %142 = math.rsqrt %141 : vector<16x1xf32>
    %143 = vector.broadcast %142 : vector<16x1xf32> to vector<16x32xf32>
    %144 = arith.mulf %134, %143 : vector<16x32xf32>
    %145 = vector.broadcast %127 : vector<1x32xf32> to vector<16x32xf32>
    %146 = arith.mulf %144, %145 : vector<16x32xf32>
    %147 = vector.broadcast %128 : vector<1x32xf32> to vector<16x32xf32>
    %148 = arith.addf %146, %147 : vector<16x32xf32>
    %149 = vector.broadcast %1 : vector<16x1xf32> to vector<16x32xf32>
    %150 = arith.mulf %148, %149 : vector<16x32xf32>
    %c0_67 = arith.constant 0 : index
    %c0_68 = arith.constant 0 : index
    %151 = vector.load %arg15[%c0_67, %c0_68] : memref<16x32xf32, #tpu.memory_space<vmem>>, vector<16x32xf32>
    tpu.vector_store %arg15[%c0_67, %c0_68], %150 {strides = array<i32>} : memref<16x32xf32, #tpu.memory_space<vmem>>, vector<16x32xf32>,
    return
  }
}

</mosaic_0001>

<bundles_post_ra>
// kernel: _lambda_.1
= control target key start
LH: loop header
LB: loop body
LE: loop exit
PB: predicated region body
PF: predicated region fallthrough
CT: control target
= control target key end

     0   :  { %20 = vsyncpa [#allocation4], 0  ;;  %s2921_s0 = inlined_call_operand.hbm [shape: f32[16,32], index: 0, kind: input, shape index: {}]   ;;  %s2922_s1 = inlined_call_operand.hbm [shape: f32[2,8,8], index: 1, kind: input, shape index: {}]   ;;  %s2923_s2 = inlined_call_operand.vmem [shape: f32[16,1], index: 2, kind: input, shape index: {}]   ;;  %s2924_s3 = inlined_call_operand.hbm [shape: f32[32,96], index: 3, kind: input, shape index: {}]   ;;  %s2925_s4 = inlined_call_operand.vmem [shape: f32[1,96], index: 4, kind: input, shape index: {}]   ;;  %s2926_s5 = inlined_call_operand.hbm [shape: f32[32,32], index: 5, kind: input, shape index: {}]   ;;  %s2927_s6 = inlined_call_operand.vmem [shape: f32[1,32], index: 6, kind: input, shape index: {}, may-alias: {6,8,12,14}]   ;;  %s2928_s7 = inlined_call_operand.vmem [shape: f32[1,32], index: 7, kind: input, shape index: {}, may-alias: {7,13}]   ;;  %s2929_s8 = inlined_call_operand.vmem [shape: f32[1,32], index: 8, kind: input, shape index: {}, may-alias: {6,8,12,14}]   ;;  %s2930_s9 = inlined_call_operand.hbm [shape: f32[32,64], index: 9, kind: input, shape index: {}]   ;;  %s2931_s10 = inlined_call_operand.vmem [shape: f32[1,64], index: 10, kind: input, shape index: {}]   ;;  %s2932_s11 = inlined_call_operand.vmem [shape: f32[64,32], index: 11, kind: input, shape index: {}]   ;;  %s2933_s12 = inlined_call_operand.vmem [shape: f32[1,32], index: 12, kind: input, shape index: {}, may-alias: {6,8,12,14}]   ;;  %s2934_s13 = inlined_call_operand.vmem [shape: f32[1,32], index: 13, kind: input, shape index: {}, may-alias: {7,13}]   ;;  %s2935_s14 = inlined_call_operand.vmem [shape: f32[1,32], index: 14, kind: input, shape index: {}, may-alias: {6,8,12,14}]   ;;  %s2936_s15 = inlined_call_operand.hbm [shape: f32[16,32], index: 15, kind: output, shape index: {}]  }
   0x1   :  { %21 = vsyncpa [#allocation7], 0 }
   0x2   :  { %22 = vsyncpa [#allocation10], 0 }
   0x3   :  { %23 = vsyncpa [#allocation5], 0  ;;  %s2477_s18 = smov [#allocation6]   ;;  %s2478_s20 = smov [#allocation9]  }
   0x4   :  { %s41_s19 = sshll.u32 %s2477_s18, 4  ;;  %s69_s21 = sshll.u32 %s2478_s20, 4  ;;  %s42_s19 = int_to_ptr.vmem [resolvable:$true] %s41_s19  ;;  %s2575_s21 = int_to_ptr.vmem [resolvable:$true] %s69_s21 }
   0x5   :  { %s2337_s24 = scalar_lea.hbm %s2922_s1, 256 }
   0x6   :  { %p2338_p0 = scmp.ne.s32.totalorder %s2922_s1, %s2337_s24  ;;  %p2341_p1 = scmp.lt.u32.totalorder %s2337_s24, %s2922_s1 }
   0x8   :  { %p2343_p2 = pnand %p2341_p1, %p2338_p0 }
   0xa   :  { %2346 = shalt.err (!%p2343_p2)
}
   0xb   :  { %s2347_s29 = scalar_lea.vmem %s42_s19, 256  ;;  %p2352_p4 = scmp.lt.s32.totalorder %s42_s19, %s42_s19 }
   0xc   :  { %p2348_p3 = scmp.ne.s32.totalorder %s42_s19, %s2347_s29  ;;  %p2353_p5 = scmp.lt.s32.totalorder %s2347_s29, %s2347_s29 }
   0xe   :  { %p2354_p6 = por %p2353_p5, %p2352_p4 }
  0x10   :  { %p2355_p7 = pnand %p2354_p6, %p2348_p3 }
  0x12   :  { %2358 = shalt.err (!%p2355_p7)
}
  0x13   :  { %s2479_s30 = smov 128   ;;  %s2480_s16 = smov 8  }
  0x14   :  { %47 = dma.hbm_to_vmem [thread:$0]  %s2922_s1, 256, %s42_s19, [#allocation7], %s2479_s30, %s2479_s30, %s2480_s16  }
  0x15   :  { %s2359_s23 = scalar_lea.hbm %s2926_s5, 512 }
  0x16   :  { %p2360_p8 = scmp.ne.s32.totalorder %s2926_s5, %s2359_s23  ;;  %p2363_p9 = scmp.lt.u32.totalorder %s2359_s23, %s2926_s5 }
  0x18   :  { %p2365_p10 = pnand %p2363_p9, %p2360_p8 }
  0x1a   :  { %2368 = shalt.err (!%p2365_p10)
}
  0x1b   :  { %s2369_s28 = scalar_lea.vmem %s2575_s21, 512  ;;  %p2374_p12 = scmp.lt.s32.totalorder %s2575_s21, %s2575_s21 }
  0x1c   :  { %p2370_p11 = scmp.ne.s32.totalorder %s2575_s21, %s2369_s28  ;;  %p2375_p13 = scmp.lt.s32.totalorder %s2369_s28, %s2369_s28 }
  0x1e   :  { %p2376_p0 = por %p2375_p13, %p2374_p12 }
  0x20   :  { %p2377_p1 = pnand %p2376_p0, %p2370_p11 }
  0x22   :  { %2380 = shalt.err (!%p2377_p1)
}
  0x23   :  { %75 = dma.hbm_to_vmem [thread:$0]  %s2926_s5, 512, %s2575_s21, [#allocation10], %s2479_s30, %s2479_s30, %s2480_s16  }
  0x24   :  { %s2481_s29 = smov [#allocation3]   ;;  %s2482_s18 = smov [#allocation8]  }
  0x25   :  { %s29_s17 = sshll.u32 %s2481_s29, 4  ;;  %s55_s20 = sshll.u32 %s2482_s18, 4  ;;  %s30_s17 = int_to_ptr.vmem [resolvable:$true] %s29_s17  ;;  %s2612_s20 = int_to_ptr.vmem [resolvable:$true] %s55_s20 }
  0x26   :  { %s2381_s24 = scalar_lea.hbm %s2921_s0, 256 }
  0x27   :  { %p2382_p2 = scmp.ne.s32.totalorder %s2921_s0, %s2381_s24  ;;  %p2385_p3 = scmp.lt.u32.totalorder %s2381_s24, %s2921_s0 }
  0x29   :  { %p2387_p4 = pnand %p2385_p3, %p2382_p2 }
  0x2b   :  { %2390 = shalt.err (!%p2387_p4)
}
  0x2c   :  { %s2391_s5 = scalar_lea.vmem %s30_s17, 256  ;;  %p2396_p6 = scmp.lt.s32.totalorder %s30_s17, %s30_s17 }
  0x2d   :  { %p2392_p5 = scmp.ne.s32.totalorder %s30_s17, %s2391_s5  ;;  %p2397_p7 = scmp.lt.s32.totalorder %s2391_s5, %s2391_s5 }
  0x2f   :  { %p2398_p8 = por %p2397_p7, %p2396_p6 }
  0x31   :  { %p2399_p9 = pnand %p2398_p8, %p2392_p5 }
  0x33   :  { %2402 = shalt.err (!%p2399_p9)
}
  0x34   :  { %35 = dma.hbm_to_vmem [thread:$0]  %s2921_s0, 256, %s30_s17, [#allocation4], %s2479_s30, %s2479_s30, %s2480_s16  }
  0x35   :  { %s2403_s18 = scalar_lea.hbm %s2924_s3, 512 }
  0x36   :  { %p2404_p10 = scmp.ne.s32.totalorder %s2924_s3, %s2403_s18  ;;  %p2407_p11 = scmp.lt.u32.totalorder %s2403_s18, %s2924_s3 }
  0x38   :  { %p2409_p12 = pnand %p2407_p11, %p2404_p10 }
  0x3a   :  { %2412 = shalt.err (!%p2409_p12)
}
  0x3b   :  { %s2413_s26 = scalar_lea.vmem %s2612_s20, 512  ;;  %p2418_p0 = scmp.lt.s32.totalorder %s2612_s20, %s2612_s20 }
  0x3c   :  { %p2414_p13 = scmp.ne.s32.totalorder %s2612_s20, %s2413_s26  ;;  %p2419_p1 = scmp.lt.s32.totalorder %s2413_s26, %s2413_s26 }
  0x3e   :  { %p2420_p2 = por %p2419_p1, %p2418_p0 }
  0x40   :  { %p2421_p3 = pnand %p2420_p2, %p2414_p13 }
  0x42   :  { %2424 = shalt.err (!%p2421_p3)
}
  0x43   :  { %61 = dma.hbm_to_vmem [thread:$0]  %s2924_s3, 512, %s2612_s20, [#allocation7], %s2479_s30, %s2479_s30, %s2480_s16  }
  0x44   :  { %s2483_s27 = smov [#allocation11]   ;;  %s2425_s1 = scalar_lea.hbm %s2930_s9, 512 }
  0x45   :  { %s87_s28 = sshll.u32 %s2483_s27, 4  ;;  %p2426_p4 = scmp.ne.s32.totalorder %s2930_s9, %s2425_s1  ;;  %s88_s28 = int_to_ptr.vmem [resolvable:$true] %s87_s28 }
  0x46   :  { %p2429_p5 = scmp.lt.u32.totalorder %s2425_s1, %s2930_s9 }
  0x48   :  { %p2431_p6 = pnand %p2429_p5, %p2426_p4 }
  0x4a   :  { %2434 = shalt.err (!%p2431_p6)
}
  0x4b   :  { %s2435_s23 = scalar_lea.vmem %s88_s28, 512  ;;  %p2440_p8 = scmp.lt.s32.totalorder %s88_s28, %s88_s28 }
  0x4c   :  { %p2436_p7 = scmp.ne.s32.totalorder %s88_s28, %s2435_s23  ;;  %p2441_p9 = scmp.lt.s32.totalorder %s2435_s23, %s2435_s23 }
  0x4e   :  { %p2442_p10 = por %p2441_p9, %p2440_p8 }
  0x50   :  { %p2443_p11 = pnand %p2442_p10, %p2436_p7 }
  0x52   :  { %2446 = shalt.err (!%p2443_p11)
}
  0x53   :  { %93 = dma.hbm_to_vmem [thread:$0]  %s2930_s9, 512, %s88_s28, [#allocation10], %s2479_s30, %s2479_s30, %s2480_s16  }
  0x54   :  { %2469 = dma.done.wait [#allocation4], 256  }
  0x55   :  { %2470 = vsyncadd [#allocation4], 4294967040 }
  0x56   :  { %2471 = dma.done.wait [#allocation7], 768  }
  0x57   :  { %2472 = vsyncadd [#allocation7], 4294966528 }
  0x58   :  { %2473 = dma.done.wait [#allocation10], 1024  }
  0x59   :  { %2474 = vsyncadd [#allocation10], 4294966272  ;;  %vm134_vm0 = vcmask 261120   ;;  %v123_v0 = vld [vmem:[#allocation8] sm:$0xff]  ;;  %v124_v1 = vld [vmem:[#allocation8 + $0x8] sm:$0xff]  ;;  %v2484_v10 = vmov 0.0  }
  0x5a   :  { %v125_v2 = vld [vmem:[#allocation8 + $0x10] sm:$0xff]  ;;  %v2237_v3 = vpack.c.bf16 %v124_v1, %v123_v0  ;;  %v126_v4 = vld [vmem:[#allocation8 + $0x18] sm:$0xff]  ;;  %v2664_v5 = vld [vmem:[#allocation3] sm:$0xff]  ;;  %2126 = vmatprep.subr.mxu0 %v2484_v10  ;;  %s2485_s25 = smov 112   ;;  %s2486_s26 = smov 120   ;;  %vm2487_vm1 = vmmov 0  }
  0x5b   :  { %v2241_v6 = vpack.c.bf16 %v126_v4, %v125_v2  ;;  %2113 = vmatprep.mubr.msk.f32.mxu1 %vm134_vm0, %v2664_v5  ;;  %v2668_v7 = vld [vmem:[#allocation3 + $0x8] sm:$0xff]  ;;  %v2005_v8 = vld [vmem:[%s2925_s4] ss:$0 sm:$0xff]  ;;  %2128 = vmatprep.mubr.msk.f32.mxu0 %vm2487_vm1, %v2484_v10  ;;  %s2488_s4 = smov 104   ;;  %s2489_s0 = smov 96   ;;  %vm232_vm2 = vcmask 64512  }
  0x5c   :  { %2238 = vmatprep.subr.bf16.mxu1 %v2237_v3  ;;  %v847_v28 = vld [vmem:[#allocation6] sm:$0xff]  ;;  %v848_v29 = vld [vmem:[#allocation6 + $0x8] sm:$0xff]  ;;  %s2490_s17 = smov 64   ;;  %s2491_s27 = smov 16   ;;  %vm1563_vm5 = vcmask 130112   ;;  %vm1574_vm6 = vcmask 195712  }
  0x5d   :  { %2240 = vmatpush3.bf16.msra.mxu1 %v2237_v3  ;;  %vm849_vm3 = vcmp.gt.f32.partialorder %v847_v28, 0.0  ;;  %vm850_vm4 = vcmp.gt.f32.partialorder %v848_v29, 0.0  ;;  %s2492_s28 = smov 24   ;;  %vm1585_vm7 = vcmask 261312   ;;  %vm1854_vm8 = vcmask 523264   ;;  %s2494_s23 = smov [#allocation12]  }
  0x5e   :  { %2242 = vmatprep.subr.bf16.mxu1 %v2241_v6  ;;  %v851_v31 = vsel %vm849_vm3, -1e+09, %v2484_v10  ;;  %v852_v36 = vsel %vm850_vm4, -1e+09, %v2484_v10  ;;  %s1991_s3 = sshll.u32 %s2494_s23, 4  ;;  %s1992_s3 = int_to_ptr.vmem [resolvable:$true] %s1991_s3 }
  0x5f   :  { %p2452_p13 = scmp.lt.s32.totalorder %s1992_s3, %s1992_s3 }
  0x61   :  { %2244 = vmatpush3.bf16.msra.mxu1 %v2241_v6 }
  0x62   :  { %2116 = vmatprep.subr.mxu1 %v2484_v10 }
  0x64   :  { %2114 = vmatmul.mubr.msk.f32.vlgmr.msra.gmra.mrb[0].mxu1 %vm134_vm0, %v2668_v7 }
  0x65   :  { %2118 = vmatprep.mubr.msk.f32.mxu1 %vm2487_vm1, %v2484_v10 }
 0x137   :  { %v2115_v9 = vpop.f32.mrb[0].mxu1 }
 0x138   :  { %v207_v11 = vpop.f32.mrb[1].mxu1  ;;  %v2685_v13 = vadd.f32 %v2115_v9, %v2005_v8 }
 0x139   :  { %v2677_v12 = vadd.f32 %v2005_v8, %v207_v11 }
 0x13b   :  { %222 = vrot.lane.b32.xlu1 %v2677_v12, %s2485_s25  ;;  %218 = vrot.lane.b32.xlu0 %v2677_v12, %s2486_s26 }
 0x13f   :  { %224 = vrot.lane.b32.xlu1 %v2685_v13, %s2485_s25  ;;  %220 = vrot.lane.b32.xlu0 %v2685_v13, %s2486_s26 }
 0x143   :  { %228 = vrot.lane.b32.xlu1 %v2685_v13, %s2488_s4  ;;  %226 = vrot.lane.b32.xlu0 %v2677_v12, %s2488_s4 }
 0x147   :  { %307 = vrot.lane.b32.xlu1 %v2685_v13, %s2489_s0  ;;  %230 = vrot.lane.b32.xlu0 %v2677_v12, %s2489_s0 }
 0x1ad   :  { %v2693_v14 = vpop.permute.xlu1 %222  ;;  %v2695_v15 = vpop.permute.xlu0 %218 }
 0x1ae   :  { %383 = vrot.lane.b32.xlu0 %v2695_v15, %s2489_s0 }
 0x1b1   :  { %v2698_v16 = vpop.permute.xlu1 %224  ;;  %v2700_v17 = vpop.permute.xlu0 %220 }
 0x1b2   :  { %535 = vrot.lane.b32.xlu0 %v2693_v14, %s2489_s0  ;;  %459 = vrot.lane.b32.xlu1 %v2700_v17, %s2489_s0 }
 0x1b5   :  { %v2704_v18 = vpop.permute.xlu0 %226  ;;  %v2708_v19 = vpop.permute.xlu1 %228 }
 0x1b6   :  { %611 = vrot.lane.b32.xlu1 %v2698_v16, %s2489_s0  ;;  %687 = vrot.lane.b32.xlu0 %v2704_v18, %s2489_s0 }
 0x1b9   :  { %v231_v20 = vpop.permute.xlu0 %230  ;;  %v308_v21 = vpop.permute.xlu1 %307 }
 0x1ba   :  { %763 = vrot.lane.b32.xlu1 %v2708_v19, %s2489_s0  ;;  %2117 = vmatpush3.xpose.msk.msra.mxu1 %vm232_vm2, %v231_v20 }
 0x1bb   :  { %2121 = vmatprep.subr.mxu1 %v2484_v10 }
 0x1bd   :  { %2119 = vmatmul.mubr.msk.f32.vlgmr.msra.gmra.mrb[2].mxu1 %vm232_vm2, %v2677_v12 }
 0x1be   :  { %2122 = vmatpush3.xpose.msk.msra.mxu1 %vm232_vm2, %v308_v21  ;;  %2123 = vmatprep.mubr.msk.f32.mxu1 %vm2487_vm1, %v2484_v10 }
 0x1bf   :  { %2131 = vmatprep.subr.mxu1 %v2484_v10 }
 0x1c1   :  { %2124 = vmatmul.mubr.msk.f32.vlgmr.msra.gmra.mrb[4].mxu1 %vm232_vm2, %v2685_v13 }
 0x1c2   :  { %2133 = vmatprep.mubr.msk.f32.mxu1 %vm2487_vm1, %v2484_v10 }
 0x220   :  { %v384_v22 = vpop.permute.xlu0 %383 }
 0x221   :  { %2127 = vmatpush3.xpose.msk.msra.mxu0 %vm232_vm2, %v384_v22 }
 0x222   :  { %2136 = vmatprep.subr.mxu0 %v2484_v10 }
 0x224   :  { %v460_v23 = vpop.permute.xlu1 %459  ;;  %2129 = vmatmul.mubr.msk.f32.vlgmr.msra.gmra.mrb[0].mxu0 %vm232_vm2, %v2695_v15  ;;  %v536_v24 = vpop.permute.xlu0 %535 }
 0x225   :  { %2132 = vmatpush3.xpose.msk.msra.mxu1 %vm232_vm2, %v460_v23  ;;  %2137 = vmatpush3.xpose.msk.msra.mxu0 %vm232_vm2, %v536_v24 }
 0x226   :  { %2138 = vmatprep.mubr.msk.f32.mxu0 %vm2487_vm1, %v2484_v10  ;;  %2141 = vmatprep.subr.mxu1 %v2484_v10 }
 0x227   :  { %2146 = vmatprep.subr.mxu0 %v2484_v10 }
 0x228   :  { %v612_v25 = vpop.permute.xlu1 %611  ;;  %2134 = vmatmul.mubr.msk.f32.vlgmr.msra.gmra.mrb[6].mxu1 %vm232_vm2, %v2700_v17  ;;  %2139 = vmatmul.mubr.msk.f32.vlgmr.msra.gmra.mrb[2].mxu0 %vm232_vm2, %v2693_v14  ;;  %v688_v26 = vpop.permute.xlu0 %687 }
 0x229   :  { %2142 = vmatpush3.xpose.msk.msra.mxu1 %vm232_vm2, %v612_v25  ;;  %2147 = vmatpush3.xpose.msk.msra.mxu0 %vm232_vm2, %v688_v26 }
 0x22a   :  { %2143 = vmatprep.mubr.msk.f32.mxu1 %vm2487_vm1, %v2484_v10  ;;  %2148 = vmatprep.mubr.msk.f32.mxu0 %vm2487_vm1, %v2484_v10 }
 0x22b   :  { %2151 = vmatprep.subr.mxu1 %v2484_v10  ;;  %2156 = vmatprep.subr.mxu0 %v2484_v10 }
 0x22c   :  { %v764_v27 = vpop.permute.xlu1 %763  ;;  %2144 = vmatmul.mubr.msk.f32.vlgmr.msra.gmra.mrb[8].mxu1 %vm232_vm2, %v2698_v16  ;;  %2149 = vmatmul.mubr.msk.f32.vlgmr.msra.gmra.mrb[4].mxu0 %vm232_vm2, %v2704_v18 }
 0x22d   :  { %2152 = vmatpush3.xpose.msk.msra.mxu1 %vm232_vm2, %v764_v27  ;;  %2153 = vmatprep.mubr.msk.f32.mxu1 %vm2487_vm1, %v2484_v10 }
 0x22e   :  { %2161 = vmatprep.subr.mxu1 %v2484_v10  ;;  %2158 = vmatprep.mubr.msk.f32.mxu0 %vm2487_vm1, %v2484_v10 }
 0x230   :  { %2154 = vmatmul.mubr.msk.f32.vlgmr.msra.gmra.mrb[10].mxu1 %vm232_vm2, %v2708_v19 }
 0x231   :  { %2163 = vmatprep.mubr.msk.f32.mxu1 %vm2487_vm1, %v2484_v10 }
 0x290   :  { %v303_v30 = vpop.f32.mrb[2].mxu1 }
 0x291   :  { %v839_v32 = vmul.f32 0.35355338, %v303_v30  ;;  %v2120_v33 = vpop.f32.mrb[3].mxu1 }
 0x293   :  { %v853_v34 = vadd.f32 %v851_v31, %v839_v32 }
 0x294   :  { %v379_v35 = vpop.f32.mrb[4].mxu1 }
 0x295   :  { %v840_v37 = vmul.f32 0.35355338, %v379_v35  ;;  %v2125_v38 = vpop.f32.mrb[5].mxu1  ;;  %v861_v39 = vsel %vm232_vm2, %v853_v34, -inf }
 0x296   :  { %862 = vmax.xlane.f32.xlu0 %v861_v39 }
 0x297   :  { %v854_v40 = vadd.f32 %v852_v36, %v840_v37 }
 0x299   :  { %v864_v41 = vsel %vm232_vm2, %v854_v40, -inf }
 0x29a   :  { %865 = vmax.xlane.f32.xlu1 %v864_v41 }
 0x2f7   :  { %v455_v42 = vpop.f32.mrb[0].mxu0 }
 0x2f8   :  { %v841_v43 = vmul.f32 0.35355338, %v455_v42  ;;  %v2130_v44 = vpop.f32.mrb[1].mxu0 }
 0x2fa   :  { %v855_v45 = vadd.f32 %v851_v31, %v841_v43 }
 0x2fb   :  { %v531_v46 = vpop.f32.mrb[6].mxu1  ;;  %v607_v47 = vpop.f32.mrb[2].mxu0 }
 0x2fc   :  { %v842_v48 = vmul.f32 0.35355338, %v531_v46  ;;  %v843_v49 = vmul.f32 0.35355338, %v607_v47  ;;  %v2135_v50 = vpop.f32.mrb[7].mxu1  ;;  %v2140_v51 = vpop.f32.mrb[3].mxu0 }
 0x2fd   :  { %v867_v52 = vsel %vm232_vm2, %v855_v45, -inf }
 0x2fe   :  { %868 = vmax.xlane.f32.xlu0 %v867_v52  ;;  %v856_v53 = vadd.f32 %v852_v36, %v842_v48  ;;  %v857_v54 = vadd.f32 %v851_v31, %v843_v49 }
 0x2ff   :  { %v683_v55 = vpop.f32.mrb[8].mxu1  ;;  %v759_v56 = vpop.f32.mrb[4].mxu0 }
 0x300   :  { %v844_v57 = vmul.f32 0.35355338, %v683_v55  ;;  %v845_v58 = vmul.f32 0.35355338, %v759_v56  ;;  %v2145_v59 = vpop.f32.mrb[9].mxu1  ;;  %v2150_v60 = vpop.f32.mrb[5].mxu0 }
 0x301   :  { %v870_v61 = vsel %vm232_vm2, %v856_v53, -inf  ;;  %v873_v62 = vsel %vm232_vm2, %v857_v54, -inf }
 0x302   :  { %871 = vmax.xlane.f32.xlu0 %v870_v61  ;;  %874 = vmax.xlane.f32.xlu1 %v873_v62  ;;  %v858_v63 = vadd.f32 %v852_v36, %v844_v57  ;;  %v859_v0 = vadd.f32 %v851_v31, %v845_v58 }
 0x303   :  { %v835_v1 = vpop.f32.mrb[10].mxu1 }
 0x304   :  { %v846_v2 = vmul.f32 0.35355338, %v835_v1  ;;  %v2155_v3 = vpop.f32.mrb[11].mxu1  ;;  %v876_v4 = vsel %vm232_vm2, %v858_v63, -inf  ;;  %v879_v6 = vsel %vm232_vm2, %v859_v0, -inf }
 0x306   :  { %877 = vmax.xlane.f32.xlu0 %v876_v4  ;;  %880 = vmax.xlane.f32.xlu1 %v879_v6  ;;  %v860_v8 = vadd.f32 %v852_v36, %v846_v2 }
 0x308   :  { %v882_v9 = vsel %vm232_vm2, %v860_v8, -inf }
 0x30a   :  { %883 = vmax.xlane.f32.xlu0 %v882_v9 }
 0x317   :  { %949 = vrot.lane.b32.xlu1 %v2677_v12, %s2490_s17 }
 0x31b   :  { %1101 = vrot.lane.b32.xlu1 %v2695_v15, %s2490_s17 }
 0x31f   :  { %1177 = vrot.lane.b32.xlu1 %v2700_v17, %s2490_s17 }
 0x320   :  { %1025 = vrot.lane.b32.xlu0 %v2685_v13, %s2490_s17 }
 0x323   :  { %1329 = vrot.lane.b32.xlu1 %v2698_v16, %s2490_s17  ;;  %v863_v21 = vpop.xlane.xlu0 %862 }
 0x324   :  { %1253 = vrot.lane.b32.xlu0 %v2693_v14, %s2490_s17  ;;  %v885_v22 = vsub.f32 %v853_v34, %v863_v21 }
 0x326   :  { %v893_v23 = vmul.f32 1.442695, %v885_v22 }
 0x327   :  { %v866_v11 = vpop.xlane.xlu1 %865 }
 0x328   :  { %v886_v20 = vsub.f32 %v854_v40, %v866_v11 }
 0x32a   :  { %v895_v12 = vmul.f32 1.442695, %v886_v20 }
 0x32c   :  { %2297 = vpow2.f32 %v895_v12 }
 0x32d   :  { %2299 = vpow2.f32 %v893_v23 }
 0x336   :  { %v2781_v15 = vpop.eup %2297 }
 0x337   :  { %v912_v17 = vsel %vm232_vm2, %v2781_v15, 0.0  ;;  %v2785_v13 = vpop.eup %2299 }
 0x338   :  { %v909_v16 = vsel %vm232_vm2, %v2785_v13, 0.0 }
 0x343   :  { %913 = vadd.xlane.f32.xlu0 %v912_v17 }
 0x347   :  { %910 = vadd.xlane.f32.xlu1 %v909_v16 }
 0x38b   :  { %v869_v14 = vpop.xlane.xlu0 %868 }
 0x38c   :  { %v887_v24 = vsub.f32 %v855_v45, %v869_v14 }
 0x38e   :  { %v897_v25 = vmul.f32 1.442695, %v887_v24 }
 0x38f   :  { %v875_v26 = vpop.xlane.xlu1 %874  ;;  %v872_v27 = vpop.xlane.xlu0 %871 }
 0x390   :  { %2301 = vpow2.f32 %v897_v25  ;;  %v889_v28 = vsub.f32 %v857_v54, %v875_v26  ;;  %v888_v29 = vsub.f32 %v856_v53, %v872_v27 }
 0x392   :  { %v901_v30 = vmul.f32 1.442695, %v889_v28  ;;  %v899_v31 = vmul.f32 1.442695, %v888_v29  ;;  %v1594_v28 = vld [vmem:[#allocation9] sm:$0xff]  ;;  %v1595_v29 = vld [vmem:[#allocation9 + $0x8] sm:$0xff] }
 0x393   :  { %v881_v32 = vpop.xlane.xlu1 %880  ;;  %v878_v33 = vpop.xlane.xlu0 %877 }
 0x394   :  { %2303 = vpow2.f32 %v901_v30  ;;  %v891_v34 = vsub.f32 %v859_v0, %v881_v32  ;;  %v890_v35 = vsub.f32 %v858_v63, %v878_v33  ;;  %v1597_v33 = vld [vmem:[#allocation9 + $0x18] sm:$0xff] }
 0x395   :  { %2305 = vpow2.f32 %v899_v31  ;;  %v2245_v31 = vpack.c.bf16 %v1595_v29, %v1594_v28 }
 0x396   :  { %v905_v36 = vmul.f32 1.442695, %v891_v34  ;;  %v903_v37 = vmul.f32 1.442695, %v890_v35 }
 0x397   :  { %v950_v38 = vpop.permute.xlu1 %949  ;;  %v884_v39 = vpop.xlane.xlu0 %883 }
 0x398   :  { %2307 = vpow2.f32 %v905_v36  ;;  %v892_v40 = vsub.f32 %v860_v8, %v884_v39  ;;  %2157 = vmatpush3.msra.mxu0 %v950_v38 }
 0x399   :  { %2309 = vpow2.f32 %v903_v37  ;;  %2166 = vmatprep.subr.mxu0 %v2484_v10 }
 0x39a   :  { %v2302_v41 = vpop.eup %2301  ;;  %v907_v42 = vmul.f32 1.442695, %v892_v40 }
 0x39b   :  { %v1026_v43 = vpop.permute.xlu0 %1025  ;;  %v915_v44 = vsel %vm232_vm2, %v2302_v41, 0.0  ;;  %v1102_v55 = vpop.permute.xlu1 %1101 }
 0x39c   :  { %2311 = vpow2.f32 %v907_v42  ;;  %916 = vadd.xlane.f32.xlu1 %v915_v44  ;;  %2162 = vmatpush3.msra.mxu1 %v1026_v43 }
 0x39d   :  { %2171 = vmatprep.subr.mxu1 %v2484_v10 }
 0x39e   :  { %v2304_v45 = vpop.eup %2303 }
 0x39f   :  { %v2306_v46 = vpop.eup %2305  ;;  %v921_v47 = vsel %vm232_vm2, %v2304_v45, 0.0  ;;  %v1178_v56 = vpop.permute.xlu1 %1177 }
 0x3a0   :  { %922 = vadd.xlane.f32.xlu1 %v921_v47  ;;  %v918_v48 = vsel %vm232_vm2, %v2306_v46, 0.0  ;;  %v1254_v57 = vpop.permute.xlu0 %1253 }
 0x3a1   :  { %919 = vadd.xlane.f32.xlu0 %v918_v48 }
 0x3a2   :  { %v2308_v49 = vpop.eup %2307 }
 0x3a3   :  { %v2310_v50 = vpop.eup %2309  ;;  %v927_v51 = vsel %vm232_vm2, %v2308_v49, 0.0  ;;  %v1330_v58 = vpop.permute.xlu1 %1329 }
 0x3a4   :  { %928 = vadd.xlane.f32.xlu1 %v927_v51  ;;  %v924_v52 = vsel %vm232_vm2, %v2310_v50, 0.0 }
 0x3a5   :  { %925 = vadd.xlane.f32.xlu0 %v924_v52 }
 0x3a6   :  { %v2796_v53 = vpop.eup %2311 }
 0x3a7   :  { %v930_v54 = vsel %vm232_vm2, %v2796_v53, 0.0 }
 0x3a9   :  { %931 = vadd.xlane.f32.xlu0 %v930_v54 }
 0x3b5   :  { %1481 = vrot.lane.b32.xlu1 %v2708_v19, %s2490_s17 }
 0x3bf   :  { %1405 = vrot.lane.b32.xlu0 %v2704_v18, %s2490_s17 }
 0x3d0   :  { %v914_v59 = vpop.xlane.xlu0 %913 }
 0x3d1   :  { %2313 = vrcp.f32 %v914_v59 }
 0x3d4   :  { %v911_v60 = vpop.xlane.xlu1 %910 }
 0x3d5   :  { %2315 = vrcp.f32 %v911_v60 }
 0x3db   :  { %v2314_v61 = vpop.eup %2313 }
 0x3dc   :  { %v942_v62 = vmul.f32 %v2314_v61, %v2781_v15 }
 0x3de   :  { %2164 = vmatmul.mubr.msk.f32.vlgmr.msra.gmra.mrb[12].mxu1 %vm232_vm2, %v942_v62  ;;  %v2493_v62 = vmov 0  }
 0x3df   :  { %v2316_v63 = vpop.eup %2315  ;;  %2172 = vmatpush3.msra.mxu1 %v1178_v56  ;;  %2173 = vmatprep.mubr.msk.f32.mxu1 %vm2487_vm1, %v2484_v10 }
 0x3e0   :  { %v941_v18 = vmul.f32 %v2316_v63, %v2785_v13  ;;  %2181 = vmatprep.subr.mxu1 %v2484_v10  ;;  %2296 = vset.pattern.permute.xlu0 %v2493_v62  ;;  %v121_v63 = vld [vmem:[%s2923_s2] sm:$0xff] }
 0x3e1   :  { %2295 = vset.pattern.permute.xlu1 %v2493_v62 }
 0x3e2   :  { %2159 = vmatmul.mubr.msk.f32.vlgmr.msra.gmra.mrb[6].mxu0 %vm232_vm2, %v941_v18 }
 0x3e3   :  { %2167 = vmatpush3.msra.mxu0 %v1102_v55  ;;  %2168 = vmatprep.mubr.msk.f32.mxu0 %vm2487_vm1, %v2484_v10 }
 0x3e4   :  { %2176 = vmatprep.subr.mxu0 %v2484_v10 }
 0x429   :  { %v917_v19 = vpop.xlane.xlu1 %916 }
 0x42a   :  { %2317 = vrcp.f32 %v917_v19 }
 0x42d   :  { %v923_v0 = vpop.xlane.xlu1 %922 }
 0x42e   :  { %2319 = vrcp.f32 %v923_v0  ;;  %v920_v1 = vpop.xlane.xlu0 %919 }
 0x42f   :  { %2321 = vrcp.f32 %v920_v1 }
 0x431   :  { %v929_v2 = vpop.xlane.xlu1 %928 }
 0x432   :  { %2323 = vrcp.f32 %v929_v2  ;;  %v926_v3 = vpop.xlane.xlu0 %925 }
 0x433   :  { %2325 = vrcp.f32 %v926_v3 }
 0x434   :  { %v2318_v4 = vpop.eup %2317 }
 0x435   :  { %v943_v6 = vmul.f32 %v2318_v4, %v2302_v41  ;;  %v1482_v13 = vpop.permute.xlu1 %1481 }
 0x436   :  { %v932_v8 = vpop.xlane.xlu0 %931 }
 0x437   :  { %2327 = vrcp.f32 %v932_v8  ;;  %2169 = vmatmul.mubr.msk.f32.vlgmr.msra.gmra.mrb[8].mxu0 %vm232_vm2, %v943_v6  ;;  %v1745_v8 = vld [vmem:[#allocation11] sm:$0xff] }
 0x438   :  { %v2320_v9 = vpop.eup %2319  ;;  %2177 = vmatpush3.msra.mxu0 %v1254_v57  ;;  %2178 = vmatprep.mubr.msk.f32.mxu0 %vm2487_vm1, %v2484_v10 }
 0x439   :  { %v2322_v11 = vpop.eup %2321  ;;  %v945_v20 = vmul.f32 %v2320_v9, %v2304_v45  ;;  %2186 = vmatprep.subr.mxu0 %v2484_v10  ;;  %v1746_v9 = vld [vmem:[#allocation11 + $0x8] sm:$0xff] }
 0x43a   :  { %v944_v21 = vmul.f32 %v2322_v11, %v2306_v46  ;;  %v1406_v22 = vpop.permute.xlu0 %1405  ;;  %v122_v11 = vld [vmem:[%s2923_s2 + $0x8] sm:$0xff] }
 0x43b   :  { %2179 = vmatmul.mubr.msk.f32.vlgmr.msra.gmra.mrb[10].mxu0 %vm232_vm2, %v945_v20  ;;  %v2253_v20 = vpack.c.bf16 %v1746_v9, %v1745_v8 }
 0x43c   :  { %v2324_v12 = vpop.eup %2323  ;;  %2174 = vmatmul.mubr.msk.f32.vlgmr.msra.gmra.mrb[14].mxu1 %vm232_vm2, %v944_v21  ;;  %2187 = vmatpush3.msra.mxu0 %v1406_v22  ;;  %v1747_v21 = vld [vmem:[#allocation11 + $0x10] sm:$0xff]  ;;  %v1748_v22 = vld [vmem:[#allocation11 + $0x18] sm:$0xff] }
 0x43d   :  { %v2326_v23 = vpop.eup %2325  ;;  %v947_v15 = vmul.f32 %v2324_v12, %v2308_v49  ;;  %2182 = vmatpush3.msra.mxu1 %v1330_v58  ;;  %2183 = vmatprep.mubr.msk.f32.mxu1 %vm2487_vm1, %v2484_v10  ;;  %v2257_v12 = vpack.c.bf16 %v1748_v22, %v1747_v21 }
 0x43e   :  { %v946_v17 = vmul.f32 %v2326_v23, %v2310_v50  ;;  %2188 = vmatprep.mubr.msk.f32.mxu0 %vm2487_vm1, %v2484_v10  ;;  %2191 = vmatprep.subr.mxu1 %v2484_v10  ;;  %v1839_v23 = vld [vmem:[%s2932_s11] sm:$0xff] }
 0x43f   :  { %2189 = vmatmul.mubr.msk.f32.vlgmr.msra.gmra.mrb[12].mxu0 %vm232_vm2, %v947_v15  ;;  %2246 = vmatprep.subr.bf16.mxu0 %v2245_v31  ;;  %v1840_v15 = vld [vmem:[%s2932_s11 + $0x8] sm:$0xff] }
 0x440   :  { %2184 = vmatmul.mubr.msk.f32.vlgmr.msra.gmra.mrb[16].mxu1 %vm232_vm2, %v946_v17  ;;  %2248 = vmatpush3.bf16.msra.mxu0 %v2245_v31  ;;  %v1841_v17 = vld [vmem:[%s2932_s11 + $0x10] sm:$0xff] }
 0x441   :  { %v2328_v16 = vpop.eup %2327  ;;  %2192 = vmatpush3.msra.mxu1 %v1482_v13  ;;  %2193 = vmatprep.mubr.msk.f32.mxu1 %vm2487_vm1, %v2484_v10  ;;  %v1596_v10 = vld [vmem:[#allocation9 + $0x10] sm:$0xff]  ;;  %v2261_v13 = vpack.c.bf16 %v1840_v15, %v1839_v23 }
 0x442   :  { %v948_v14 = vmul.f32 %v2328_v16, %v2796_v53  ;;  %v2249_v34 = vpack.c.bf16 %v1597_v33, %v1596_v10  ;;  %v2032_v53 = vld [vmem:[%s2927_s6] ss:$0 sm:$0xff]  ;;  %2254 = vmatprep.subr.bf16.mxu1 %v2253_v20  ;;  %v1842_v16 = vld [vmem:[%s2932_s11 + $0x18] sm:$0xff] }
 0x443   :  { %v2035_v33 = vld [vmem:[%s2928_s7] ss:$0 sm:$0xff] }
 0x444   :  { %2194 = vmatmul.mubr.msk.f32.vlgmr.msra.gmra.mrb[18].mxu1 %vm232_vm2, %v948_v14  ;;  %2250 = vmatprep.subr.bf16.mxu0 %v2249_v34  ;;  %v2265_v14 = vpack.c.bf16 %v1842_v16, %v1841_v17  ;;  %v2043_v15 = vld [vmem:[%s2934_s13] ss:$0 sm:$0xff]  ;;  %s2447_s13 = scalar_lea.vmem %s1992_s3, 256 }
 0x445   :  { %2252 = vmatpush3.bf16.msra.mxu0 %v2249_v34  ;;  %2256 = vmatpush3.bf16.msra.mxu1 %v2253_v20  ;;  %p2448_p12 = scmp.ne.s32.totalorder %s1992_s3, %s2447_s13  ;;  %p2453_p0 = scmp.lt.s32.totalorder %s2447_s13, %s2447_s13 }
 0x446   :  { %2258 = vmatprep.subr.bf16.mxu1 %v2257_v12  ;;  %2262 = vmatprep.subr.bf16.mxu0 %v2261_v13 }
 0x447   :  { %p2454_p1 = por %p2453_p0, %p2452_p13 }
 0x449   :  { %2260 = vmatpush3.bf16.msra.mxu1 %v2257_v12  ;;  %p2455_p2 = pnand %p2454_p1, %p2448_p12 }
 0x4b1   :  { %v1097_v24 = vpop.f32.mrb[12].mxu1 }
 0x4b2   :  { %1558 = vst.msk [vmem:[#allocation2 + $0x8] sm:$0xff] %vm232_vm2, %v1097_v24  ;;  %v2165_v25 = vpop.f32.mrb[13].mxu1  ;;  %v1843_v24 = vld [vmem:[%s2932_s11 + $0x20] sm:$0xff] }
 0x4b3   :  { %v1844_v25 = vld [vmem:[%s2932_s11 + $0x28] sm:$0xff] }
 0x4b5   :  { %v1021_v26 = vpop.f32.mrb[6].mxu0 }
 0x4b6   :  { %1557 = vst.msk [vmem:[#allocation2] sm:$0xff] %vm232_vm2, %v1021_v26  ;;  %v2160_v27 = vpop.f32.mrb[7].mxu0  ;;  %v2269_v26 = vpack.c.bf16 %v1844_v25, %v1843_v24 }
 0x50a   :  { %v1173_v30 = vpop.f32.mrb[8].mxu0 }
 0x50b   :  { %v2170_v32 = vpop.f32.mrb[9].mxu0  ;;  %1560 = vrot.lane.b32.xlu0 %v1173_v30, %s2480_s16 }
 0x50e   :  { %v1325_v35 = vpop.f32.mrb[10].mxu0 }
 0x50f   :  { %v1249_v36 = vpop.f32.mrb[14].mxu1  ;;  %1571 = vrot.lane.b32.xlu0 %v1325_v35, %s2491_s27  ;;  %v2180_v37 = vpop.f32.mrb[11].mxu0 }
 0x510   :  { %1566 = vrot.lane.b32.xlu1 %v1249_v36, %s2480_s16  ;;  %v2175_v38 = vpop.f32.mrb[15].mxu1  ;;  %v2036_v37 = vld [vmem:[%s2929_s8] ss:$0 sm:$0xff] }
 0x512   :  { %v1477_v39 = vpop.f32.mrb[12].mxu0 }
 0x513   :  { %v1401_v40 = vpop.f32.mrb[16].mxu1  ;;  %1582 = vrot.lane.b32.xlu0 %v1477_v39, %s2492_s28  ;;  %v2190_v41 = vpop.f32.mrb[13].mxu0 }
 0x514   :  { %1577 = vrot.lane.b32.xlu1 %v1401_v40, %s2491_s27  ;;  %v2185_v42 = vpop.f32.mrb[17].mxu1 }
 0x517   :  { %v1553_v43 = vpop.f32.mrb[18].mxu1 }
 0x518   :  { %1588 = vrot.lane.b32.xlu1 %v1553_v43, %s2492_s28  ;;  %v2195_v44 = vpop.f32.mrb[19].mxu1 }
 0x57d   :  { %v1561_v45 = vpop.permute.xlu0 %1560 }
 0x57e   :  { %1564 = vst.msk [vmem:[#allocation2] sm:$0xff] %vm1563_vm5, %v1561_v45 }
 0x581   :  { %v1572_v46 = vpop.permute.xlu0 %1571 }
 0x582   :  { %v1567_v47 = vpop.permute.xlu1 %1566  ;;  %1575 = vst.msk [vmem:[#allocation2] sm:$0xff] %vm1574_vm6, %v1572_v46  ;;  %v1845_v46 = vld [vmem:[%s2932_s11 + $0x30] sm:$0xff] }
 0x583   :  { %1569 = vst.msk [vmem:[#allocation2 + $0x8] sm:$0xff] %vm1563_vm5, %v1567_v47  ;;  %v1846_v47 = vld [vmem:[%s2932_s11 + $0x38] sm:$0xff] }
 0x585   :  { %v1583_v48 = vpop.permute.xlu0 %1582 }
 0x586   :  { %v1578_v49 = vpop.permute.xlu1 %1577  ;;  %1586 = vst.msk [vmem:[#allocation2] sm:$0xff] %vm1585_vm7, %v1583_v48  ;;  %v2273_v48 = vpack.c.bf16 %v1846_v47, %v1845_v46 }
 0x587   :  { %1580 = vst.msk [vmem:[#allocation2 + $0x8] sm:$0xff] %vm1574_vm6, %v1578_v49  ;;  %v2037_v49 = vld [vmem:[%s2931_s10] ss:$0 sm:$0xff] }
 0x58a   :  { %v1589_v50 = vpop.permute.xlu1 %1588 }
 0x58b   :  { %1591 = vst.msk [vmem:[#allocation2 + $0x8] sm:$0xff] %vm1585_vm7, %v1589_v50 }
 0x58d   :  { %v1592_v51 = vld [vmem:[#allocation2] sm:$0xff] }
 0x58e   :  { %2204 = vmatprep.mubr.msk.f32.mxu0 %vm134_vm0, %v1592_v51 }
 0x592   :  { %v1593_v52 = vld [vmem:[#allocation2 + $0x8] sm:$0xff] }
 0x593   :  { %2205 = vmatmul.mubr.msk.f32.vlgmr.msra.gmra.mrb[14].mxu0 %vm134_vm0, %v1593_v52 }
 0x594   :  { %2264 = vmatpush3.bf16.msra.mxu0 %v2261_v13  ;;  %v2044_v13 = vld [vmem:[%s2935_s14] ss:$0 sm:$0xff] }
 0x595   :  { %2266 = vmatprep.subr.bf16.mxu0 %v2265_v14 }
 0x598   :  { %2268 = vmatpush3.bf16.msra.mxu0 %v2265_v14 }
 0x599   :  { %2270 = vmatprep.subr.bf16.mxu0 %v2269_v26 }
 0x59c   :  { %2272 = vmatpush3.bf16.msra.mxu0 %v2269_v26 }
 0x59d   :  { %2274 = vmatprep.subr.bf16.mxu0 %v2273_v48 }
 0x5a0   :  { %2276 = vmatpush3.bf16.msra.mxu0 %v2273_v48 }
 0x666   :  { %v2206_v54 = vpop.f32.mrb[14].mxu0 }
 0x667   :  { %v1683_v55 = vadd.f32 %v2206_v54, %v2032_v53  ;;  %v1677_v56 = vpop.f32.mrb[15].mxu0 }
 0x668   :  { %v1678_v57 = vadd.f32 %v2032_v53, %v1677_v56  ;;  %v2040_v56 = vld [vmem:[%s2933_s12] ss:$0 sm:$0xff] }
 0x669   :  { %v1687_v58 = vadd.f32 %v1683_v55, %v2668_v7 }
 0x66a   :  { %v1686_v59 = vadd.f32 %v1678_v57, %v2664_v5 }
 0x66b   :  { %v1693_v60 = vsel %vm134_vm0, %v1687_v58, 0.0 }
 0x66c   :  { %1694 = vadd.xlane.f32.xlu1 %v1693_v60  ;;  %v1690_v61 = vsel %vm134_vm0, %v1686_v59, 0.0 }
 0x66d   :  { %1691 = vadd.xlane.f32.xlu0 %v1690_v61 }
 0x67d   :  { %1735 = vperm.xlu1 %2295, %v121_v63  }
 0x6f9   :  { %v1695_v18 = vpop.xlane.xlu1 %1694 }
 0x6fa   :  { %v1698_v19 = vmul.f32 0.03125, %v1695_v18  ;;  %v1692_v0 = vpop.xlane.xlu0 %1691 }
 0x6fb   :  { %v1697_v7 = vmul.f32 0.03125, %v1692_v0 }
 0x6fc   :  { %v1700_v1 = vsub.f32 %v1687_v58, %v1698_v19 }
 0x6fd   :  { %v1699_v5 = vsub.f32 %v1686_v59, %v1697_v7  ;;  %v1736_v41 = vpop.permute.xlu1 %1735 }
 0x6fe   :  { %v1702_v2 = vmul.f32 %v1700_v1, %v1700_v1 }
 0x6ff   :  { %v1701_v4 = vmul.f32 %v1699_v5, %v1699_v5 }
 0x700   :  { %v1706_v3 = vsel %vm134_vm0, %v1702_v2, 0.0 }
 0x701   :  { %1707 = vadd.xlane.f32.xlu0 %v1706_v3  ;;  %v1703_v6 = vsel %vm134_vm0, %v1701_v4, 0.0 }
 0x705   :  { %1704 = vadd.xlane.f32.xlu0 %v1703_v6 }
 0x71b   :  { %1740 = vperm.xlu0 %2296, %v122_v11  }
 0x78e   :  { %v1708_v27 = vpop.xlane.xlu0 %1707 }
 0x78f   :  { %v1710_v28 = vmul.f32 0.03125, %v1708_v27 }
 0x791   :  { %v1712_v29 = vadd.f32 1e-05, %v1710_v28 }
 0x792   :  { %v1705_v30 = vpop.xlane.xlu0 %1704 }
 0x793   :  { %2329 = vrsqrt.f32 %v1712_v29  ;;  %v1709_v31 = vmul.f32 0.03125, %v1705_v30 }
 0x795   :  { %v1711_v32 = vadd.f32 1e-05, %v1709_v31 }
 0x797   :  { %2331 = vrsqrt.f32 %v1711_v32 }
 0x79a   :  { %v2876_v42 = vpop.permute.xlu0 %1740 }
 0x79d   :  { %v2330_v10 = vpop.eup %2329 }
 0x79e   :  { %v1716_v34 = vmul.f32 %v2330_v10, %v1700_v1 }
 0x7a0   :  { %v1724_v36 = vmul.f32 %v2035_v33, %v1716_v34 }
 0x7a1   :  { %v2332_v35 = vpop.eup %2331 }
 0x7a2   :  { %v1715_v38 = vmul.f32 %v2332_v35, %v1699_v5  ;;  %v1732_v40 = vadd.f32 %v2036_v37, %v1724_v36 }
 0x7a4   :  { %v1723_v39 = vmul.f32 %v2035_v33, %v1715_v38  ;;  %v1744_v45 = vmul.f32 %v2876_v42, %v1732_v40 }
 0x7a6   :  { %v1731_v43 = vadd.f32 %v2036_v37, %v1723_v39 }
 0x7a8   :  { %v1743_v44 = vmul.f32 %v1736_v41, %v1731_v43 }
 0x7aa   :  { %2215 = vmatprep.mubr.msk.f32.mxu1 %vm134_vm0, %v1743_v44 }
 0x7ab   :  { %2216 = vmatmul.mubr.msk.f32.vlgmr.msra.gmra.mrb[20].mxu1 %vm134_vm0, %v1744_v45 }
 0x87e   :  { %v2217_v50 = vpop.f32.mrb[20].mxu1 }
 0x87f   :  { %v1834_v51 = vadd.f32 %v2217_v50, %v2037_v49  ;;  %v1828_v52 = vpop.f32.mrb[21].mxu1 }
 0x880   :  { %v1829_v53 = vadd.f32 %v2037_v49, %v1828_v52 }
 0x881   :  { %v1838_v55 = vmax.f32 %v1834_v51, 0.0 }
 0x882   :  { %v1837_v54 = vmax.f32 %v1829_v53, 0.0 }
 0x884   :  { %2234 = vmatprep.mubr.msk.f32.mxu0 %vm1854_vm8, %v1837_v54 }
 0x885   :  { %2235 = vmatmul.mubr.msk.f32.vlgmr.msra.gmra.mrb[16].mxu0 %vm1854_vm8, %v1838_v55 }
 0x958   :  { %v2236_v57 = vpop.f32.mrb[16].mxu0 }
 0x959   :  { %v1933_v58 = vadd.f32 %v2236_v57, %v2040_v56  ;;  %v1927_v59 = vpop.f32.mrb[17].mxu0 }
 0x95a   :  { %v1928_v60 = vadd.f32 %v2040_v56, %v1927_v59 }
 0x95b   :  { %v1937_v61 = vadd.f32 %v1933_v58, %v1744_v45 }
 0x95c   :  { %v1936_v62 = vadd.f32 %v1928_v60, %v1743_v44 }
 0x95d   :  { %v1943_v63 = vsel %vm134_vm0, %v1937_v61, 0.0 }
 0x95e   :  { %1944 = vadd.xlane.f32.xlu0 %v1943_v63  ;;  %v1940_v18 = vsel %vm134_vm0, %v1936_v62, 0.0 }
 0x95f   :  { %1941 = vadd.xlane.f32.xlu1 %v1940_v18 }
 0x9eb   :  { %v1945_v19 = vpop.xlane.xlu0 %1944 }
 0x9ec   :  { %v1947_v0 = vmul.f32 0.03125, %v1945_v19  ;;  %v1942_v7 = vpop.xlane.xlu1 %1941 }
 0x9ed   :  { %v1946_v1 = vmul.f32 0.03125, %v1942_v7 }
 0x9ee   :  { %v1949_v5 = vsub.f32 %v1937_v61, %v1947_v0 }
 0x9ef   :  { %v1948_v2 = vsub.f32 %v1936_v62, %v1946_v1 }
 0x9f0   :  { %v1951_v6 = vmul.f32 %v1949_v5, %v1949_v5 }
 0x9f1   :  { %v1950_v3 = vmul.f32 %v1948_v2, %v1948_v2 }
 0x9f2   :  { %v1955_v8 = vsel %vm134_vm0, %v1951_v6, 0.0 }
 0x9f3   :  { %v1952_v4 = vsel %vm134_vm0, %v1950_v3, 0.0 }
 0x9f4   :  { %1953 = vadd.xlane.f32.xlu1 %v1952_v4 }
 0x9f8   :  { %1956 = vadd.xlane.f32.xlu1 %v1955_v8 }
 0xa81   :  { %v1954_v9 = vpop.xlane.xlu1 %1953 }
 0xa82   :  { %v1958_v11 = vmul.f32 0.03125, %v1954_v9 }
 0xa84   :  { %v1960_v20 = vadd.f32 1e-05, %v1958_v11 }
 0xa85   :  { %v1957_v21 = vpop.xlane.xlu1 %1956 }
 0xa86   :  { %2333 = vrsqrt.f32 %v1960_v20  ;;  %v1959_v22 = vmul.f32 0.03125, %v1957_v21 }
 0xa88   :  { %v1961_v12 = vadd.f32 1e-05, %v1959_v22 }
 0xa8a   :  { %2335 = vrsqrt.f32 %v1961_v12 }
 0xa90   :  { %v2334_v23 = vpop.eup %2333 }
 0xa91   :  { %v1964_v17 = vmul.f32 %v2334_v23, %v1948_v2 }
 0xa93   :  { %v1972_v16 = vmul.f32 %v2043_v15, %v1964_v17 }
 0xa94   :  { %v2336_v14 = vpop.eup %2335 }
 0xa95   :  { %v1965_v24 = vmul.f32 %v2336_v14, %v1949_v5  ;;  %v1980_v25 = vadd.f32 %v2044_v13, %v1972_v16 }
 0xa97   :  { %v1973_v26 = vmul.f32 %v2043_v15, %v1965_v24  ;;  %v1982_v27 = vmul.f32 %v1980_v25, %v1736_v41 }
 0xa99   :  { %v1981_v28 = vadd.f32 %v2044_v13, %v1973_v26  ;;  %1984 = vst.msk [vmem:[#allocation12] sm:$0xff] %vm134_vm0, %v1982_v27 }
 0xa9b   :  { %v1983_v29 = vmul.f32 %v1981_v28, %v2876_v42 }
 0xa9d   :  { %1985 = vst.msk [vmem:[#allocation12 + $0x8] sm:$0xff] %vm134_vm0, %v1983_v29 }
 0xa9e   :  { %2458 = shalt.err (!%p2455_p2)
}
 0xa9f   :  { %s2459_s9 = scalar_lea.hbm %s2936_s15, 256 }
 0xaa0   :  { %p2460_p3 = scmp.ne.s32.totalorder %s2936_s15, %s2459_s9  ;;  %p2463_p4 = scmp.lt.u32.totalorder %s2459_s9, %s2936_s15 }
 0xaa2   :  { %p2465_p5 = pnand %p2463_p4, %p2460_p3 }
 0xaa4   :  { %2468 = shalt.err (!%p2465_p5)
}
 0xaa5   :  { %1997 = dma.vmem_to_hbm [thread:$0]  %s1992_s3, 256, %s2936_s15, [#allocation5], %s2479_s30, %s2479_s30, %s2480_s16  }
 0xaa6   :  { %2475 = dma.done.wait [#allocation5], 256  }
 0xaa7   :  { %2476 = vsyncadd [#allocation5], 4294967040 }
 0xaa8   :  { %2001 = vsyncpa [#allocation4], 1 }
 0xaa9   :  { %2002 = vsyncpa [#allocation7], 1 }
 0xaaa   :  { %2003 = vsyncpa [#allocation10], 1 }
 0xaab   :  { %2004 = vsyncpa [#allocation5], 1 }

</bundles_post_ra>
